<compile_context>
chip_gen: v7x
topology: tpu7x:2x2x1
jax: 0.10.0
libtpu: 0.0.40
codegen_flags: <defaults>
</compile_context>

<pallas_src>
import functools

import jax
import jax.numpy as jnp
from jax.experimental import pallas as pl
from jax.experimental.pallas import tpu as pltpu

_LANES = 128
_ACC_SUBLANES = 8


def _round_up(x, m):
    return ((x + m - 1) // m) * m


def _num_tensorcores():
    """Best-effort TensorCores-per-chip (2 on v7x, else 1).  Conservative:
    returns 1 unless an unambiguous per-chip TC count is reported."""
    try:
        info = pltpu.get_tpu_info()
    except Exception:
        return 1
    for attr in ("num_tensorcores", "tensorcores_per_chip", "num_cores_per_chip"):
        v = getattr(info, attr, None)
        if v is None:
            continue
        try:
            v = int(v)
        except (TypeError, ValueError):
            continue
        if v >= 1:
            return min(v, 2)
    return 1


def _abs_diff_sum_kernel(o_ref, l_ref, out_ref, acc_ref, *,
                         n_rows, tile_rows, tiles_per_core, need_mask):
    c = pl.program_id(0)   # partial-sum slot (CORE_PARALLEL split on v7x)
    i = pl.program_id(1)   # row-tile within this slot (reduction axis)

    @pl.when(i == 0)
    def _():
        acc_ref[...] = jnp.zeros_like(acc_ref)

    # Widen to f32 in-register (v5e has no bf16 VALU; HBM traffic stays narrow).
    ad = jnp.abs(o_ref[...].astype(jnp.float32) - l_ref[...].astype(jnp.float32))

    def _accumulate(vals):
        # (tile_rows, D) -> (tile_rows//8, 8, D); cross-vreg VALU adds into a
        # single (8, D) accumulator row.  Reshape splits only the leading dim,
        # so it does not cross the (8, 128) tile boundary (free).
        acc_ref[...] += jnp.sum(
            vals.reshape(tile_rows // _ACC_SUBLANES, _ACC_SUBLANES, -1), axis=0)

    if need_mask:
        tile_start = (c * tiles_per_core + i) * tile_rows
        # True only for the partial tail tile and for fully-clamped duplicate
        # tiles (rows >= n_rows) -- steady-state tiles skip all masking work.
        is_edge = tile_start + tile_rows > n_rows

        @pl.when(is_edge)
        def _():
            row_ids = tile_start + jax.lax.broadcasted_iota(
                jnp.int32, ad.shape, 0)
            _accumulate(jnp.where(row_ids < n_rows, ad, 0.0))

        @pl.when(jnp.logical_not(is_edge))
        def _():
            _accumulate(ad)
    else:
        _accumulate(ad)

    @pl.when(i == tiles_per_core - 1)
    def _():
        out_ref[0, 0] = jnp.sum(acc_ref[...])   # single epilogue reduce


def abs_diff_sum(outputs, labels, *, tile_rows=None, num_cores=None,
                 per_block_vmem_bytes=4 << 20):
    """sum(|outputs - labels|) via a tiled, lane-dense Pallas reduction."""
    outputs = jnp.asarray(outputs)
    labels = jnp.asarray(labels)
    assert outputs.shape == labels.shape, (outputs.shape, labels.shape)

    # --- Lane-dense repacking for the common regression shapes (N,), (N, 1),
    #     or any last dim not a multiple of 128.  Zero-padded elements
    #     contribute |0 - 0| = 0, so no extra masking is needed for them.
    if outputs.ndim != 2 or outputs.shape[-1] % _LANES != 0:
        total = int(outputs.size)
        pad = (-total) % _LANES
        o_flat = outputs.reshape(-1)
        l_flat = labels.reshape(-1)
        if pad:
            o_flat = jnp.pad(o_flat, (0, pad))
            l_flat = jnp.pad(l_flat, (0, pad))
        outputs = o_flat.reshape(-1, _LANES)
        labels = l_flat.reshape(-1, _LANES)

    N, D = outputs.shape
    itemsize = jnp.dtype(outputs.dtype).itemsize
    mult = 16 if itemsize == 2 else 8          # sublane multiple (packing)

    # --- Tile rows from a VMEM byte budget (per double-buffered input block).
    if tile_rows is None:
        tile_rows = per_block_vmem_bytes // (D * itemsize)
    tile_rows = max(mult, (int(tile_rows) // mult) * mult)
    tile_rows = min(tile_rows, _round_up(N, mult))

    row_tiles = pl.cdiv(N, tile_rows)
    if num_cores is None:
        num_cores = _num_tensorcores()
    # Never give a core only clamped duplicate tiles (wasted HBM traffic).
    num_cores = max(1, min(int(num_cores), row_tiles))
    tiles_per_core = pl.cdiv(row_tiles, num_cores)
    # Padded rows (tail of last tile / duplicated clamped tiles) must be masked.
    need_mask = (num_cores * tiles_per_core * tile_rows) != N
    last_block = row_tiles - 1

    def in_map(c, i):
        # Clamp fully-padded tiles onto the last valid block; their rows are
        # >= N so the in-kernel mask zeroes their contribution.
        return (jnp.minimum(c * tiles_per_core + i, last_block), 0)

    kernel = functools.partial(
        _abs_diff_sum_kernel, n_rows=N, tile_rows=tile_rows,
        tiles_per_core=tiles_per_core, need_mask=need_mask)

    block_bytes = tile_rows * D * itemsize
    # 2 inputs x 2 pipeline buffers + tiny (8, D) accumulator + headroom.
    vmem_limit = int(min(60 << 20, max(32 << 20, 5 * block_bytes + (2 << 20))))

    if num_cores > 1:
        # Real per-TensorCore split (v7x): each core owns its own HBM path.
        dim_sem = (pltpu.CORE_PARALLEL, pltpu.ARBITRARY)
    else:
        dim_sem = ("arbitrary", "arbitrary")

    cost = pl.CostEstimate(
        flops=3 * N * D,                                 # sub + abs + add
        transcendentals=0,
        bytes_accessed=2 * N * D * itemsize + 4 * num_cores)

    partials = pl.pallas_call(
        kernel,
        out_shape=jax.ShapeDtypeStruct((num_cores, 1), jnp.float32),
        grid_spec=pltpu.PrefetchScalarGridSpec(
            num_scalar_prefetch=0,
            grid=(num_cores, tiles_per_core),
            in_specs=[
                pl.BlockSpec((tile_rows, D), in_map),
                pl.BlockSpec((tile_rows, D), in_map),
            ],
            out_specs=pl.BlockSpec(
                (1, 1), lambda c, i: (c, 0),
                memory_space=pltpu.MemorySpace.SMEM),
            scratch_shapes=[pltpu.VMEM((_ACC_SUBLANES, D), jnp.float32)],
        ),
        compiler_params=pltpu.CompilerParams(
            dimension_semantics=dim_sem,
            vmem_limit_bytes=vmem_limit),
        cost_estimate=cost,
    )(outputs, labels)
    return jnp.sum(partials)


def regression_metrics_forward(epoch_loss, outputs, labels, phase, config, idx):
    """JAX/Pallas equivalent of RegressionMetrics.forward."""
    n = jnp.asarray(labels).shape[0]
    mae = abs_diff_sum(outputs, labels) / (1.0 * n)
    rmse = jnp.sqrt(jnp.asarray(epoch_loss, dtype=jnp.float32))
    # TODO(synk): host sync + print kept only to match the torch module's
    # semantics; on a real hot path return the device scalars and log
    # asynchronously instead of blocking the step.
    mae_f = float(jax.block_until_ready(mae))
    rmse_f = float(rmse)
    print('{} Loss {}: {:.4f} RMSE: {:.4f} MAE: {:.4f}'.format(
        phase, idx, epoch_loss, rmse_f, mae_f))
    epoch_metrics = {
        'loss': epoch_loss,
        'mae': mae_f,
        'rmse': rmse_f,
        'checkpointer': -epoch_loss,
    }
    return epoch_metrics


if __name__ == "__main__":
    key = jax.random.PRNGKey(0)
    k1, k2, k3, k4, k5, k6 = jax.random.split(key, 6)

    # (1) Typical regression label shape (N, 1) -> lane-dense repacking path
    #     (flatten + zero-pad to (rows, 128)), plus the full forward glue.
    N1 = 37
    out1 = jax.random.normal(k1, (N1, 1), dtype=jnp.float32)
    lab1 = jax.random.normal(k2, (N1, 1), dtype=jnp.float32)
    epoch_loss = 0.25  # scalar passed in by the training loop

    metrics = regression_metrics_forward(
        epoch_loss, out1, lab1, phase="val", config=None, idx=0)

    mae_ref = float(jnp.sum(jnp.abs(out1 - lab1)) / (1.0 * N1))
    rmse_ref = float(jnp.sqrt(jnp.float32(epoch_loss)))
    assert abs(metrics['mae'] - mae_ref) < 1e-4 * max(1.0, abs(mae_ref)), \
        (metrics['mae'], mae_ref)
    assert abs(metrics['rmse'] - rmse_ref) < 1e-6, (metrics['rmse'], rmse_ref)
    assert metrics['checkpointer'] == -epoch_loss

    # (2) 2-D f32 case; N not a multiple of the tile -> gated tail masking.
    N2, D2 = 300, 128
    out2 = jax.random.normal(k3, (N2, D2), dtype=jnp.float32)
    lab2 = jax.random.normal(k4, (N2, D2), dtype=jnp.float32)
    s_pallas = float(jax.block_until_ready(abs_diff_sum(out2, lab2)))
    s_ref = float(jnp.sum(jnp.abs(out2 - lab2)))
    assert abs(s_pallas - s_ref) < 1e-3 * max(1.0, abs(s_ref)), (s_pallas, s_ref)

    # (3) bf16, forced small tile -> multi-tile accumulation into the (8, D)
    #     vreg-row accumulator + in-kernel widening to f32.
    N3, D3 = 136, 128
    out3 = jax.random.normal(k5, (N3, D3), dtype=jnp.float32).astype(jnp.bfloat16)
    lab3 = jax.random.normal(k6, (N3, D3), dtype=jnp.float32).astype(jnp.bfloat16)
    s_pallas = float(jax.block_until_ready(
        abs_diff_sum(out3, lab3, tile_rows=64)))
    s_ref = float(jnp.sum(jnp.abs(out3.astype(jnp.float32) -
                                  lab3.astype(jnp.float32))))
    assert abs(s_pallas - s_ref) < 1e-3 * max(1.0, abs(s_ref)), (s_pallas, s_ref)

    print("KERNEL_OK")
</pallas_src>

<mosaic_0001>
module attributes {stable_mosaic.version = 11 : i64} {
  func.func @_abs_diff_sum_kernel(%arg0: i32, %arg1: i32, %arg2: memref<8x128xf32, #tpu.memory_space<vmem>>, %arg3: memref<8x128xf32, #tpu.memory_space<vmem>>, %arg4: memref<1x1xf32, #tpu.memory_space<smem>>, %arg5: memref<8x128xf32, #tpu.memory_space<vmem>>) attributes {dimension_semantics = [#tpu.dimension_semantics<arbitrary>, #tpu.dimension_semantics<arbitrary>], iteration_bounds = array<i64: 1, 1>, scalar_prefetch = 0 : i64, scratch_operands = 1 : i64, tpu.core_type = #tpu.core_type<tc>, window_params = [{transform_indices = @transform_0, window_bounds = array<i64: 8, 128>}, {transform_indices = @transform_1, window_bounds = array<i64: 8, 128>}, {transform_indices = @transform_2, window_bounds = array<i64: 1, 1>}]} {
    %c0_i32 = arith.constant 0 : i32
    %0 = arith.cmpi eq, %arg1, %c0_i32 : i32
    %1 = arith.extui %0 : i1 to i32
    %c0_i32_0 = arith.constant 0 : i32
    %2 = arith.cmpi ne, %1, %c0_i32_0 : i32
    scf.if %2 {
      %cst = arith.constant 0.000000e+00 : f32
      %20 = vector.broadcast %cst : f32 to vector<8x128xf32>
      %c0_10 = arith.constant 0 : index
      %c0_11 = arith.constant 0 : index
      %21 = vector.load %arg5[%c0_10, %c0_11] : memref<8x128xf32, #tpu.memory_space<vmem>>, vector<8x128xf32>
      tpu.vector_store %arg5[%c0_10, %c0_11], %20 {strides = array<i32>} : memref<8x128xf32, #tpu.memory_space<vmem>>, vector<8x128xf32>,
    } else {
    }
    %c0 = arith.constant 0 : index
    %c0_1 = arith.constant 0 : index
    %3 = vector.load %arg2[%c0, %c0_1] : memref<8x128xf32, #tpu.memory_space<vmem>>, vector<8x128xf32>
    %c0_2 = arith.constant 0 : index
    %c0_3 = arith.constant 0 : index
    %4 = vector.load %arg3[%c0_2, %c0_3] : memref<8x128xf32, #tpu.memory_space<vmem>>, vector<8x128xf32>
    %5 = arith.subf %3, %4 : vector<8x128xf32>
    %6 = math.absf %5 : vector<8x128xf32>
    %c1_i32 = arith.constant 1 : i32
    %7 = arith.muli %arg0, %c1_i32 : i32
    %8 = arith.addi %7, %arg1 : i32
    %c8_i32 = arith.constant 8 : i32
    %9 = arith.muli %8, %c8_i32 : i32
    %c8_i32_4 = arith.constant 8 : i32
    %10 = arith.addi %9, %c8_i32_4 : i32
    %c1_i32_5 = arith.constant 1 : i32
    %11 = arith.cmpi sgt, %10, %c1_i32_5 : i32
    %12 = arith.extui %11 : i1 to i32
    %c0_i32_6 = arith.constant 0 : i32
    %13 = arith.cmpi ne, %12, %c0_i32_6 : i32
    scf.if %13 {
      %20 = tpu.iota {dimensions = array<i32: 0>} : vector<8x128xi32>
      %21 = vector.broadcast %9 : i32 to vector<8x128xi32>
      %22 = arith.addi %21, %20 : vector<8x128xi32>
      %c1_i32_10 = arith.constant 1 : i32
      %23 = vector.broadcast %c1_i32_10 : i32 to vector<8x128xi32>
      %24 = arith.cmpi slt, %22, %23 : vector<8x128xi32>
      %cst = arith.constant 0.000000e+00 : f32
      %25 = vector.broadcast %cst : f32 to vector<8x128xf32>
      %26 = arith.select %24, %6, %25 : vector<8x128xi1>, vector<8x128xf32>
      %c0_11 = arith.constant 0 : index
      %c0_12 = arith.constant 0 : index
      %27 = vector.load %arg5[%c0_11, %c0_12] : memref<8x128xf32, #tpu.memory_space<vmem>>, vector<8x128xf32>
      %28 = vector.shape_cast %26 : vector<8x128xf32> to vector<1x8x128xf32>
      %cst_13 = arith.constant dense<0.000000e+00> : vector<8x128xf32>
      %29 = vector.multi_reduction <add>, %28, %cst_13 [0] : vector<1x8x128xf32> to vector<8x128xf32>
      %30 = arith.addf %27, %29 : vector<8x128xf32>
      %c0_14 = arith.constant 0 : index
      %c0_15 = arith.constant 0 : index
      %31 = vector.load %arg5[%c0_14, %c0_15] : memref<8x128xf32, #tpu.memory_space<vmem>>, vector<8x128xf32>
      tpu.vector_store %arg5[%c0_14, %c0_15], %30 {strides = array<i32>} : memref<8x128xf32, #tpu.memory_space<vmem>>, vector<8x128xf32>,
    } else {
    }
    %true = arith.constant true
    %14 = arith.xori %11, %true : i1
    %15 = arith.extui %14 : i1 to i32
    %c0_i32_7 = arith.constant 0 : i32
    %16 = arith.cmpi ne, %15, %c0_i32_7 : i32
    scf.if %16 {
      %c0_10 = arith.constant 0 : index
      %c0_11 = arith.constant 0 : index
      %20 = vector.load %arg5[%c0_10, %c0_11] : memref<8x128xf32, #tpu.memory_space<vmem>>, vector<8x128xf32>
      %21 = vector.shape_cast %6 : vector<8x128xf32> to vector<1x8x128xf32>
      %cst = arith.constant dense<0.000000e+00> : vector<8x128xf32>
      %22 = vector.multi_reduction <add>, %21, %cst [0] : vector<1x8x128xf32> to vector<8x128xf32>
      %23 = arith.addf %20, %22 : vector<8x128xf32>
      %c0_12 = arith.constant 0 : index
      %c0_13 = arith.constant 0 : index
      %24 = vector.load %arg5[%c0_12, %c0_13] : memref<8x128xf32, #tpu.memory_space<vmem>>, vector<8x128xf32>
      tpu.vector_store %arg5[%c0_12, %c0_13], %23 {strides = array<i32>} : memref<8x128xf32, #tpu.memory_space<vmem>>, vector<8x128xf32>,
    } else {
    }
    %c0_i32_8 = arith.constant 0 : i32
    %17 = arith.cmpi eq, %arg1, %c0_i32_8 : i32
    %18 = arith.extui %17 : i1 to i32
    %c0_i32_9 = arith.constant 0 : i32
    %19 = arith.cmpi ne, %18, %c0_i32_9 : i32
    scf.if %19 {
      %c0_10 = arith.constant 0 : index
      %c0_11 = arith.constant 0 : index
      %20 = vector.load %arg5[%c0_10, %c0_11] : memref<8x128xf32, #tpu.memory_space<vmem>>, vector<8x128xf32>
      %21 = vector.shape_cast %20 : vector<8x128xf32> to vector<1x8x128xf32>
      %cst = arith.constant dense<0.000000e+00> : vector<1xf32>
      %22 = vector.multi_reduction <add>, %21, %cst [1, 2] : vector<1x8x128xf32> to vector<1xf32>
      %23 = vector.shape_cast %22 : vector<1xf32> to vector<1x1x1xf32>
      %24 = vector.extract %23[0, 0, 0] : f32 from vector<1x1x1xf32>
      %c0_12 = arith.constant 0 : index
      %c0_13 = arith.constant 0 : index
      %25 = memref.load %arg4[%c0_12, %c0_13] : memref<1x1xf32, #tpu.memory_space<smem>>
      memref.store %24, %arg4[%c0_12, %c0_13] : memref<1x1xf32, #tpu.memory_space<smem>>
    } else {
    }
    return
  }
  func.func @transform_0(%arg0: i32, %arg1: i32) -> (i32, i32) {
    %c1_i32 = arith.constant 1 : i32
    %0 = arith.muli %arg0, %c1_i32 : i32
    %1 = arith.addi %0, %arg1 : i32
    %c0_i32 = arith.constant 0 : i32
    %2 = arith.minsi %1, %c0_i32 : i32
    %c0_i32_0 = arith.constant 0 : i32
    %c0_i32_1 = arith.constant 0 : i32
    return %2, %c0_i32_0 : i32, i32
  }
  func.func @transform_1(%arg0: i32, %arg1: i32) -> (i32, i32) {
    %c1_i32 = arith.constant 1 : i32
    %0 = arith.muli %arg0, %c1_i32 : i32
    %1 = arith.addi %0, %arg1 : i32
    %c0_i32 = arith.constant 0 : i32
    %2 = arith.minsi %1, %c0_i32 : i32
    %c0_i32_0 = arith.constant 0 : i32
    %c0_i32_1 = arith.constant 0 : i32
    return %2, %c0_i32_0 : i32, i32
  }
  func.func @transform_2(%arg0: i32, %arg1: i32) -> (i32, i32) {
    %c0_i32 = arith.constant 0 : i32
    %c0_i32_0 = arith.constant 0 : i32
    return %arg0, %c0_i32 : i32, i32
  }
}

</mosaic_0001>

<bundles_post_ra>
// kernel: tpu_custom_call.1
= control target key start
LH: loop header
LB: loop body
LE: loop exit
PB: predicated region body
PF: predicated region fallthrough
CT: control target
= control target key end

     0   :  { %7 = vsyncpa [#allocation4], 0  ;;  %s236_s0 = inlined_call_operand.hbm [shape: f32[1,128], index: 0, kind: input, shape index: {}]   ;;  %s237_s1 = inlined_call_operand.vmem [shape: f32[1,128], index: 1, kind: input, shape index: {}]   ;;  %s238_s2 = inlined_call_operand.hbm [shape: f32[1,1], index: 2, kind: output, shape index: {}]  }
   0x1   :  { %8 = vsyncpa [#allocation5], 0 }
   0x2   :  { %19 = vsyncadd [#allocation4], 112  ;;  %s190_s9 = smov [#allocation3]   ;;  %s154_s13 = scalar_lea.hbm %s236_s0, 16 }
   0x3   :  { %s23_s10 = sshll.u32 %s190_s9, 4  ;;  %p155_p0 = scmp.ne.s32.totalorder %s236_s0, %s154_s13  ;;  %s24_s10 = int_to_ptr.vmem [resolvable:$true] %s23_s10 }
   0x4   :  { %p158_p1 = scmp.lt.u32.totalorder %s154_s13, %s236_s0 }
   0x6   :  { %p160_p2 = pnand %p158_p1, %p155_p0 }
   0x8   :  { %163 = shalt.err (!%p160_p2)
}
   0x9   :  { %s164_s18 = scalar_lea.vmem %s24_s10, 16  ;;  %s168_s19 = scalar_lea.vmem %s24_s10, 128 }
   0xa   :  { %p165_p3 = scmp.ne.s32.totalorder %s24_s10, %s164_s18  ;;  %p169_p4 = scmp.lt.s32.totalorder %s24_s10, %s24_s10 }
   0xb   :  { %p170_p5 = scmp.lt.s32.totalorder %s168_s19, %s164_s18 }
   0xd   :  { %p171_p6 = por %p170_p5, %p169_p4 }
   0xf   :  { %p172_p7 = pnand %p171_p6, %p165_p3 }
  0x11   :  { %175 = shalt.err (!%p172_p7)
}
  0x12   :  { %s191_s20 = smov 16   ;;  %s192_s21 = smov 1  }
  0x13   :  { %29 = dma.hbm_to_vmem [thread:$0]  %s236_s0, 16, %s24_s10, [#allocation4], %s191_s20, %s191_s20, %s192_s21  }
  0x14   :  { %186 = dma.done.wait [#allocation4], 128  }
  0x15   :  { %187 = vsyncadd [#allocation4], 4294967168  ;;  %v96_v0 = vlaneseq  ;;  %v85_v2 = vld [vmem:[#allocation3] sm:$0xff]  ;;  %s176_s28 = scalar_lea.hbm %s238_s2, 16 }
  0x16   :  { %v86_v3 = vld [vmem:[%s237_s1] sm:$0xff]  ;;  %p177_p8 = scmp.ne.s32.totalorder %s238_s2, %s176_s28  ;;  %p180_p9 = scmp.lt.u32.totalorder %s176_s28, %s238_s2 }
  0x17   :  { %v97_v1 = vshrl.u32 %v96_v0, 7  ;;  %v87_v4 = vsub.f32 %v85_v2, %v86_v3 }
  0x18   :  { %p182_p10 = pnand %p180_p9, %p177_p8 }
  0x19   :  { %vm100_vm0 = vcmp.lt.s32.totalorder %v97_v1, 1  ;;  %v88_v5 = vand.u32 2147483647, %v87_v4 }
  0x1b   :  { %v101_v6 = vsel %vm100_vm0, %v88_v5, 0.0 }
  0x1c   :  { %118 = vadd.xlane.f32.xlu0 %v101_v6 }
  0xa9   :  { %v119_v7 = vpop.xlane.xlu0 %118 }
  0xaa   :  { %v120_v8 = vrot.slane %v119_v7, 4 }
  0xac   :  { %v121_v9 = vadd.f32 %v120_v8, %v119_v7 }
  0xae   :  { %v122_v10 = vrot.slane %v121_v9, 2 }
  0xb0   :  { %v123_v11 = vadd.f32 %v122_v10, %v121_v9 }
  0xb2   :  { %v124_v12 = vrot.slane %v123_v11, 1 }
  0xb4   :  { %v125_v13 = vadd.f32 %v124_v12, %v123_v11 }
  0xb6   :  { %148 = vpush %v125_v13 }
  0xe7   :  { %s149_s0 = spop %148 }
  0xe8   :  { %128 = sst [smem:[#allocation6]] %s149_s0 }
  0xe9   :  { %185 = shalt.err (!%p182_p10)
}
  0xea   :  { %s193_s4 = smov [#allocation6]  }
  0xeb   :  { %136 = dma.smem_to_hbm %s193_s4, 16, %s238_s2, [#allocation5]  }
  0xec   :  { %188 = dma.done.wait [#allocation5], 16  }
  0xed   :  { %189 = vsyncadd [#allocation5], 4294967280 }
  0xee   :  { %140 = sfence }
  0xef   :  { %141 = vsyncpa [#allocation4], 1 }
  0xf0   :  { %142 = vsyncpa [#allocation5], 1 }

</bundles_post_ra>
